<compile_context>
chip_gen: v6e
topology: v6e:2x2x1
jax: 0.10.0
libtpu: 0.0.40
codegen_flags: <defaults>
</compile_context>

<pallas_src>
import jax
import jax.numpy as jnp
from jax.experimental import pallas as pl
from jax.experimental.pallas import tpu as pltpu


def _round_up(x, m):
    return (x + m - 1) // m * m


# --------------------------------------------------------------- kernel ----
def _ac_fused_kernel(state_ref, w1_ref, b1_ref, w2_ref, b2_ref, out_ref):
    # state_ref: [TB, D_in] (io dtype)   w1_ref: [D_in, 2H] (io dtype)
    # b1_ref:    [1, 2H]    (f32)        w2_ref: [2H, N_pad] (io dtype)
    # b2_ref:    [1, N_pad] (f32)        out_ref: [TB, N_pad] (io dtype)
    x = state_ref[...]

    # Fused layer 1 (critic | actor): one MXU push, f32 accumulate, bias+ReLU.
    h = jnp.dot(x, w1_ref[...], preferred_element_type=jnp.float32) + b1_ref[...]
    h = jnp.maximum(h, 0.0)

    # Fused block-diagonal layer 2: mu in lanes [0:A], value in lane A.
    out = jnp.dot(h.astype(w2_ref.dtype), w2_ref[...],
                  preferred_element_type=jnp.float32) + b2_ref[...]
    out_ref[...] = out.astype(out_ref.dtype)


# ------------------------------------------------------- param fusion ------
def fuse_params(params, io_dtype=jnp.bfloat16):
    """Precompute the fused/packed weights once (call at init, not per step)."""
    H = params["wc1"].shape[1]
    A = params["wa2"].shape[1]
    N_pad = max(128, _round_up(A + 1, 128))   # lane-dense output slab width

    w1 = jnp.concatenate([params["wc1"], params["wa1"]], axis=1).astype(io_dtype)
    b1 = jnp.concatenate([params["bc1"], params["ba1"]], axis=1).astype(jnp.float32)

    w2 = jnp.zeros((2 * H, N_pad), jnp.float32)
    w2 = w2.at[H:, :A].set(params["wa2"])          # actor half of h -> mu lanes
    w2 = w2.at[:H, A:A + 1].set(params["wc2"])     # critic half of h -> value lane
    w2 = w2.astype(io_dtype)

    b2 = jnp.zeros((1, N_pad), jnp.float32)
    b2 = b2.at[:, :A].set(params["ba2"])
    b2 = b2.at[:, A:A + 1].set(params["bc2"])

    return dict(w1=w1, b1=b1, w2=w2, b2=b2)


# ------------------------------------- pl.Buffered(1) capability probe -----
_SINGLE_BUFFER_WEIGHTS_OK = None


def _probe_copy_kernel(x_ref, o_ref):
    o_ref[...] = x_ref[...]


def _single_buffer_weights_supported():
    """Probe once whether pipeline_mode=pl.Buffered(1) lowers on this backend."""
    global _SINGLE_BUFFER_WEIGHTS_OK
    if _SINGLE_BUFFER_WEIGHTS_OK is None:
        try:
            x = jnp.zeros((8, 128), jnp.float32)
            out = pl.pallas_call(
                _probe_copy_kernel,
                out_shape=jax.ShapeDtypeStruct((16, 128), jnp.float32),
                grid=(2,),
                in_specs=[pl.BlockSpec((8, 128), lambda i: (0, 0),
                                       pipeline_mode=pl.Buffered(1))],
                out_specs=pl.BlockSpec((8, 128), lambda i: (i, 0)),
            )(x)
            jax.block_until_ready(out)
            _SINGLE_BUFFER_WEIGHTS_OK = True
        except Exception:
            _SINGLE_BUFFER_WEIGHTS_OK = False
    return _SINGLE_BUFFER_WEIGHTS_OK


# -------------------------------------------------------------- forward ----
_IO_TILE_VMEM_BUDGET = 24 << 20   # budget for the double-buffered state/out tiles


def actor_critic_forward(state, params, *, fused=None, batch_tile=4096,
                         io_dtype=jnp.bfloat16, min_pallas_batch=1024):
    """Fused actor-critic forward pass.  Returns (mu, std, value).

    (mu, std) fully parameterize the Normal distribution the PyTorch module
    returns; value is the critic output.
    """
    B, D_in = state.shape

    # Small batches: launch/DMA setup dwarfs compute -> let XLA fuse it.
    if B < min_pallas_batch:
        return _reference_forward(state, params)

    if fused is None:
        fused = fuse_params(params, io_dtype=io_dtype)
    w1, b1, w2, b2 = fused["w1"], fused["b1"], fused["w2"], fused["b2"]
    io_dtype = w1.dtype
    H2 = w1.shape[1]          # 2 * layer_1_dims
    N_pad = w2.shape[1]       # lane-dense output width (>=128)
    A = params["log_std"].shape[1]

    # ---- batch tiling: minimal padding, >=2 tiles (keeps both v7x TCs busy),
    # tile size capped so the double-buffered state+out tiles fit the budget.
    it = jnp.dtype(io_dtype).itemsize
    d_lanes = _round_up(D_in, 128)
    bytes_per_row = (d_lanes + N_pad) * it
    tb_cap = max(8, (_IO_TILE_VMEM_BUDGET // (2 * bytes_per_row)) // 8 * 8)
    bt = min(_round_up(max(batch_tile, 8), 8), tb_cap)

    B8 = _round_up(B, 8)
    n_tiles = pl.cdiv(B8, bt)
    if B8 >= 16:
        n_tiles = max(n_tiles, 2)          # v7x megacore: keep both TCs busy
    TB = _round_up(pl.cdiv(B8, n_tiles), 8)
    n_tiles = pl.cdiv(B8, TB)
    B_pad = TB * n_tiles                   # pads < 8 rows per tile, not a full tile

    state_p = state.astype(io_dtype)
    if B_pad != B:
        state_p = jnp.pad(state_p, ((0, B_pad - B), (0, 0)))

    # Constant-index weight/bias blocks: single-buffer when supported.
    const_kw = (dict(pipeline_mode=pl.Buffered(1))
                if _single_buffer_weights_supported() else {})

    in_specs = [
        pl.BlockSpec((TB, D_in), lambda i: (i, 0)),                 # state tile
        pl.BlockSpec((D_in, H2), lambda i: (0, 0), **const_kw),     # fused W1
        pl.BlockSpec((1, H2), lambda i: (0, 0), **const_kw),        # fused b1
        pl.BlockSpec((H2, N_pad), lambda i: (0, 0), **const_kw),    # fused W2
        pl.BlockSpec((1, N_pad), lambda i: (0, 0), **const_kw),     # fused b2
    ]

    # Scoped-VMEM limit from the actual footprint (+headroom), floored at the
    # v6e/v7x default (32 MiB), capped below v7x's 64 MiB physical VMEM.
    tile_io = TB * (d_lanes + N_pad) * it
    weights = (_round_up(D_in, 8) * _round_up(H2, 128)
               + _round_up(H2, 8) * N_pad) * it
    biases = 8 * (_round_up(H2, 128) + N_pad) * 4
    need = 2 * tile_io + 2 * (weights + biases)
    vmem_limit = int(min(max(2 * need + (4 << 20), 32 << 20), 48 << 20))

    out = pl.pallas_call(
        _ac_fused_kernel,
        out_shape=jax.ShapeDtypeStruct((B_pad, N_pad), io_dtype),
        grid_spec=pltpu.PrefetchScalarGridSpec(
            num_scalar_prefetch=0,
            grid=(n_tiles,),
            in_specs=in_specs,
            out_specs=pl.BlockSpec((TB, N_pad), lambda i: (i, 0)),
        ),
        compiler_params=pltpu.CompilerParams(
            dimension_semantics=("parallel",),   # independent batch tiles
            vmem_limit_bytes=vmem_limit,
        ),
    )(state_p, w1, b1, w2, b2)

    # Packed lane-dense slab: mu in lanes [0:A], value in lane A.
    # TODO(synk): if the output writeback ever binds at huge B, benchmark a
    # narrow (TB, A+1) masked-store output against this 128-lane slab.
    mu = out[:B, :A]
    value = out[:B, A:A + 1]
    std = jnp.broadcast_to(jnp.exp(params["log_std"]), mu.shape)
    # TODO(synk): torch.distributions.Normal itself has no Pallas equivalent;
    # (mu, std) fully parameterize it.
    return mu, std, value


# --------------------------------------------------- init & reference ------
def init_params(key, input_dims, layer_1_dims, action_dims, std=0.0):
    """Deterministic init mimicking nn.Linear's uniform(-1/sqrt(fan_in), ...)."""
    def linear(key, fan_in, fan_out):
        kw, kb = jax.random.split(key)
        bound = 1.0 / jnp.sqrt(fan_in)
        w = jax.random.uniform(kw, (fan_in, fan_out), jnp.float32, -bound, bound)
        b = jax.random.uniform(kb, (1, fan_out), jnp.float32, -bound, bound)
        return w, b

    k1, k2, k3, k4 = jax.random.split(key, 4)
    wc1, bc1 = linear(k1, input_dims, layer_1_dims)
    wc2, bc2 = linear(k2, layer_1_dims, 1)
    wa1, ba1 = linear(k3, input_dims, layer_1_dims)
    wa2, ba2 = linear(k4, layer_1_dims, action_dims)
    log_std = jnp.ones((1, action_dims), jnp.float32) * std

    return dict(wc1=wc1, bc1=bc1, wc2=wc2, bc2=bc2,
                wa1=wa1, ba1=ba1, wa2=wa2, ba2=ba2,
                log_std=log_std)


def _reference_forward(state, p):
    h_c = jnp.maximum(state @ p["wc1"] + p["bc1"], 0.0)
    value = h_c @ p["wc2"] + p["bc2"]
    h_a = jnp.maximum(state @ p["wa1"] + p["ba1"], 0.0)
    mu = h_a @ p["wa2"] + p["ba2"]
    std = jnp.broadcast_to(jnp.exp(p["log_std"]), mu.shape)
    return mu, std, value


# ------------------------------------------------------------------ main ---
if __name__ == "__main__":
    batch, input_dims, layer_1_dims, action_dims = 8, 16, 32, 4

    key = jax.random.PRNGKey(0)
    k_state, k_params, k_big = jax.random.split(key, 3)
    params = init_params(k_params, input_dims, layer_1_dims, action_dims, std=0.0)

    # ---- exact-precision check (f32 I/O) at small batch; force Pallas path ----
    state = jax.random.normal(k_state, (batch, input_dims), jnp.float32)
    fused_f32 = fuse_params(params, io_dtype=jnp.float32)     # hoisted once
    mu, std, value = actor_critic_forward(
        state, params, fused=fused_f32, min_pallas_batch=0)
    jax.block_until_ready((mu, std, value))

    mu_r, std_r, value_r = _reference_forward(state, params)
    assert jnp.allclose(mu.astype(jnp.float32), mu_r, atol=1e-5), "mu mismatch"
    assert jnp.allclose(std, std_r, atol=1e-5), "std mismatch"
    assert jnp.allclose(value.astype(jnp.float32), value_r, atol=1e-5), "value mismatch"

    # ---- bf16 I/O, unaligned batch > 1024: multi-tile parallel grid + padding ----
    big_B = 1032
    state_big = jax.random.normal(k_big, (big_B, input_dims), jnp.float32)
    fused_bf16 = fuse_params(params, io_dtype=jnp.bfloat16)   # hoisted once
    mu_b, std_b, value_b = actor_critic_forward(state_big, params, fused=fused_bf16)
    jax.block_until_ready((mu_b, std_b, value_b))

    mu_rb, std_rb, value_rb = _reference_forward(state_big, params)
    assert jnp.allclose(mu_b.astype(jnp.float32), mu_rb, atol=5e-2), "mu (bf16) mismatch"
    assert jnp.allclose(std_b, std_rb, atol=1e-5), "std (bf16) mismatch"
    assert jnp.allclose(value_b.astype(jnp.float32), value_rb, atol=5e-2), "value (bf16) mismatch"

    print("KERNEL_OK")
</pallas_src>

<mosaic_0001>
module attributes {stable_mosaic.version = 11 : i64} {
  func.func @_probe_copy_kernel(%arg0: i32, %arg1: memref<8x128xf32, #tpu.memory_space<vmem>>, %arg2: memref<8x128xf32, #tpu.memory_space<vmem>>) attributes {dimension_semantics = [#tpu.dimension_semantics<arbitrary>], iteration_bounds = array<i64: 2>, scalar_prefetch = 0 : i64, scratch_operands = 0 : i64, tpu.core_type = #tpu.core_type<tc>, window_params = [{pipeline_mode = #tpu.pipeline_mode<synchronous>, transform_indices = @transform_0, window_bounds = array<i64: 8, 128>}, {transform_indices = @transform_1, window_bounds = array<i64: 8, 128>}]} {
    %c0 = arith.constant 0 : index
    %c0_0 = arith.constant 0 : index
    %0 = vector.load %arg1[%c0, %c0_0] : memref<8x128xf32, #tpu.memory_space<vmem>>, vector<8x128xf32>
    %c0_1 = arith.constant 0 : index
    %c0_2 = arith.constant 0 : index
    %1 = vector.load %arg2[%c0_1, %c0_2] : memref<8x128xf32, #tpu.memory_space<vmem>>, vector<8x128xf32>
    tpu.vector_store %arg2[%c0_1, %c0_2], %0 {strides = array<i32>} : memref<8x128xf32, #tpu.memory_space<vmem>>, vector<8x128xf32>,
    return
  }
  func.func @transform_0(%arg0: i32) -> (i32, i32) {
    %c0_i32 = arith.constant 0 : i32
    %c0_i32_0 = arith.constant 0 : i32
    %c0_i32_1 = arith.constant 0 : i32
    return %c0_i32, %c0_i32_0 : i32, i32
  }
  func.func @transform_1(%arg0: i32) -> (i32, i32) {
    %c0_i32 = arith.constant 0 : i32
    %c0_i32_0 = arith.constant 0 : i32
    return %arg0, %c0_i32 : i32, i32
  }
}

module attributes {stable_mosaic.version = 11 : i64} {
  func.func @_ac_fused_kernel(%arg0: i32, %arg1: memref<8x16xf32, #tpu.memory_space<vmem>>, %arg2: memref<16x64xf32, #tpu.memory_space<vmem>>, %arg3: memref<1x64xf32, #tpu.memory_space<vmem>>, %arg4: memref<64x128xf32, #tpu.memory_space<vmem>>, %arg5: memref<1x128xf32, #tpu.memory_space<vmem>>, %arg6: memref<8x128xf32, #tpu.memory_space<vmem>>) attributes {dimension_semantics = [#tpu.dimension_semantics<parallel>], iteration_bounds = array<i64: 1>, scalar_prefetch = 0 : i64, scratch_operands = 0 : i64, tpu.core_type = #tpu.core_type<tc>, window_params = [{transform_indices = @transform_0, window_bounds = array<i64: 8, 16>}, {pipeline_mode = #tpu.pipeline_mode<synchronous>, transform_indices = @transform_1, window_bounds = array<i64: 16, 64>}, {pipeline_mode = #tpu.pipeline_mode<synchronous>, transform_indices = @transform_2, window_bounds = array<i64: 1, 64>}, {pipeline_mode = #tpu.pipeline_mode<synchronous>, transform_indices = @transform_3, window_bounds = array<i64: 64, 128>}, {pipeline_mode = #tpu.pipeline_mode<synchronous>, transform_indices = @transform_4, window_bounds = array<i64: 1, 128>}, {transform_indices = @transform_5, window_bounds = array<i64: 8, 128>}]} {
    %c0 = arith.constant 0 : index
    %c0_0 = arith.constant 0 : index
    %0 = vector.load %arg1[%c0, %c0_0] : memref<8x16xf32, #tpu.memory_space<vmem>>, vector<8x16xf32>
    %c0_1 = arith.constant 0 : index
    %c0_2 = arith.constant 0 : index
    %1 = vector.load %arg2[%c0_1, %c0_2] : memref<16x64xf32, #tpu.memory_space<vmem>>, vector<16x64xf32>
    %cst = arith.constant dense<0.000000e+00> : vector<8x64xf32>
    %2 = tpu.matmul %0, %1, %cst {dimension_numbers = #tpu.dot_dimension_numbers<[1], [0], [0], [1], [0, 0, 1, 1], [], []>} : vector<8x16xf32>, vector<16x64xf32>, vector<8x64xf32> -> vector<8x64xf32>
    %c0_3 = arith.constant 0 : index
    %c0_4 = arith.constant 0 : index
    %3 = vector.load %arg3[%c0_3, %c0_4] : memref<1x64xf32, #tpu.memory_space<vmem>>, vector<1x64xf32>
    %4 = vector.broadcast %3 : vector<1x64xf32> to vector<8x64xf32>
    %5 = arith.addf %2, %4 : vector<8x64xf32>
    %cst_5 = arith.constant 0.000000e+00 : f32
    %6 = vector.broadcast %cst_5 : f32 to vector<8x64xf32>
    %7 = arith.maximumf %5, %6 : vector<8x64xf32>
    %c0_6 = arith.constant 0 : index
    %c0_7 = arith.constant 0 : index
    %8 = vector.load %arg4[%c0_6, %c0_7] : memref<64x128xf32, #tpu.memory_space<vmem>>, vector<64x128xf32>
    %cst_8 = arith.constant dense<0.000000e+00> : vector<8x128xf32>
    %9 = tpu.matmul %7, %8, %cst_8 {dimension_numbers = #tpu.dot_dimension_numbers<[1], [0], [0], [1], [0, 0, 1, 1], [], []>} : vector<8x64xf32>, vector<64x128xf32>, vector<8x128xf32> -> vector<8x128xf32>
    %c0_9 = arith.constant 0 : index
    %c0_10 = arith.constant 0 : index
    %10 = vector.load %arg5[%c0_9, %c0_10] : memref<1x128xf32, #tpu.memory_space<vmem>>, vector<1x128xf32>
    %11 = vector.broadcast %10 : vector<1x128xf32> to vector<8x128xf32>
    %12 = arith.addf %9, %11 : vector<8x128xf32>
    %c0_11 = arith.constant 0 : index
    %c0_12 = arith.constant 0 : index
    %13 = vector.load %arg6[%c0_11, %c0_12] : memref<8x128xf32, #tpu.memory_space<vmem>>, vector<8x128xf32>
    tpu.vector_store %arg6[%c0_11, %c0_12], %12 {strides = array<i32>} : memref<8x128xf32, #tpu.memory_space<vmem>>, vector<8x128xf32>,
    return
  }
  func.func @transform_0(%arg0: i32) -> (i32, i32) {
    %c0_i32 = arith.constant 0 : i32
    %c0_i32_0 = arith.constant 0 : i32
    return %arg0, %c0_i32 : i32, i32
  }
  func.func @transform_1(%arg0: i32) -> (i32, i32) {
    %c0_i32 = arith.constant 0 : i32
    %c0_i32_0 = arith.constant 0 : i32
    %c0_i32_1 = arith.constant 0 : i32
    return %c0_i32, %c0_i32_0 : i32, i32
  }
  func.func @transform_2(%arg0: i32) -> (i32, i32) {
    %c0_i32 = arith.constant 0 : i32
    %c0_i32_0 = arith.constant 0 : i32
    %c0_i32_1 = arith.constant 0 : i32
    return %c0_i32, %c0_i32_0 : i32, i32
  }
  func.func @transform_3(%arg0: i32) -> (i32, i32) {
    %c0_i32 = arith.constant 0 : i32
    %c0_i32_0 = arith.constant 0 : i32
    %c0_i32_1 = arith.constant 0 : i32
    return %c0_i32, %c0_i32_0 : i32, i32
  }
  func.func @transform_4(%arg0: i32) -> (i32, i32) {
    %c0_i32 = arith.constant 0 : i32
    %c0_i32_0 = arith.constant 0 : i32
    %c0_i32_1 = arith.constant 0 : i32
    return %c0_i32, %c0_i32_0 : i32, i32
  }
  func.func @transform_5(%arg0: i32) -> (i32, i32) {
    %c0_i32 = arith.constant 0 : i32
    %c0_i32_0 = arith.constant 0 : i32
    return %arg0, %c0_i32 : i32, i32
  }
}

</mosaic_0001>

<bundles_post_ra>
// kernel: tpu_custom_call.1
= control target key start
LH: loop header
LB: loop body
LE: loop exit
PB: predicated region body
PF: predicated region fallthrough
CT: control target
= control target key end

     0   :  { %6 = vsyncpa [#allocation3], 0  ;;  %s453_s0 = inlined_call_operand.hbm [shape: f32[8,128], index: 0, kind: input, shape index: {}]   ;;  %s454_s1 = inlined_call_operand.hbm [shape: f32[16,128], index: 1, kind: output, shape index: {}]  }
   0x1   :  { %7 = vsyncpa [#allocation4], 0 }
   0x2   :  { %9 = vsyncpa [#allocation4 + $0x1], 0  ;;  %s347_s6 = smov 0   ;;  %s349_s7 = smov 0  }
   0x3   :  { %s351_s8 = smov 0   ;;  %s353_s9 = smov 0  }
   0x4 LB: > { %s368_s10 = sadd.s32 4294967295, %s333_s9   ;;  %s183_s11 = sadd.s32 4294967294, %s333_s9   ;;  %s333_s9 = sphi %s353_s9, %s462_s9   ;;  %s329_s8 = sphi %s351_s8, %s461_s8   ;;  %s325_s7 = sphi %s349_s7, %s460_s7   ;;  %s321_s6 = sphi %s347_s6, %s459_s6  }
   0x5   : > { %s372_s12 = sadd.s32 1, %s333_s9   ;;  %s43_s13 = sadd.s32 1, %s329_s8 }
   0x6   : > { %s40_s14 = ssub.s32 %s333_s9, %s372_s12  ;;  %p53_p0 = scmp.ne.s32.totalorder %s329_s8, %s325_s7 }
   0x7   : > { %p41_p1 = scmp.eq.s32.totalorder %s40_s14, 0  ;;  %p54_p2 = scmp.eq.s32.totalorder %s368_s10, 1 }
   0x8   : > { %p59_p3 = scmp.ne.s32.totalorder %s325_s7, %s321_s6  ;;  %p60_p4 = scmp.eq.s32.totalorder %s183_s11, 1 }
   0x9   : > { %s383_s15 = scalar_select %p41_p1, %s329_s8, %s43_s13  }
   0xa   : > { %p385_p5 = por %p54_p2, %p53_p0  ;;  %p389_p6 = por %p60_p4, %p59_p3 }
   0xb   : > { %p184_p7 = scmp.ge.s32.totalorder %s333_s9, 1  ;;  %p67_p8 = scmp.lt.s32.totalorder %s333_s9, 3 }
   0xc   : > { %s456_s17 = scalar_select %p389_p6, 1, 0 }
   0xd   : > { %p207_p9 = scmp.eq.s32.totalorder %s368_s10, 0  ;;  %p396_p10 = pnand %p184_p7, %p67_p8 }
   0xe   : > { %s335_s19 = smov [#allocation2]  }
   0xf   : > { %s80_s20 = sshll.u32 %s335_s19, 4  ;;  %p199_p11 = pneg %p396_p10  ;;  %s81_s20 = int_to_ptr.vmem [resolvable:$true] %s80_s20 }
  0x10   : > { %s254_s21 = scalar_lea.vmem %s81_s20, 128  ;;  %p262_p3 = scmp.lt.s32.totalorder %s81_s20, %s81_s20 }
  0x11   : > { %p200_p12 = pnand %p207_p9, %p199_p11  ;;  %p255_p0 = scmp.ne.s32.totalorder %s81_s20, %s254_s21 }
  0x12   : > { %p263_p4 = scmp.lt.s32.totalorder %s254_s21, %s254_s21 }
  0x13   : > { %p245_p13 = pneg %p200_p12 }
  0x14   : > { %p264_p6 = por %p263_p4, %p262_p3 }
  0x15   : > { %p257_p1 = pnand %p255_p0, %p245_p13 }
  0x17   : > { %p258_p2 = pneg %p257_p1 }
  0x19   : > { %p265_p7 = pnand %p264_p6, %p258_p2 }
  0x1b   : > { %268 = shalt.err (!%p265_p7)
}
  0x1c   : > { %202 = dma.hbm_to_vmem [thread:$0]  (!%p200_p12), %s453_s0, 128, %s81_s20, [#allocation3]  }
  0x1d   : > { %93 = sbr.rel (%p396_p10) target bundleno = 60 (0x3c), region = 24 }
  0x22   : > { %312 = dma.done.wait (%p207_p9), [#allocation3], 128  }
  0x23   : > { %314 = vsyncadd (%p207_p9), [#allocation3], 4294967168  ;;  %s105_s24 = sand.u32 1, %s325_s7   ;;  %s190_s28 = sshll.u32 %s368_s10, 7  ;;  %v108_v0 = vld [vmem:[#allocation2] sm:$0xff] }
  0x24   : > { %s188_s25 = sshll.u32 %s105_s24, 3  ;;  %s122_s2 = scalar_lea.hbm %s454_s1, %s190_s28 }
  0x25   : > { %s107_s26 = scalar_lea.vmem [#allocation5], %s188_s25  ;;  %s111_s3 = scalar_lea.sflag [#allocation4], %s105_s24 }
  0x26   : > { %s124_s27 = sshll.u32 %s107_s26, 4  ;;  %109 = vst [vmem:[%s107_s26] sm:$0xff] %v108_v0  ;;  %s336_s5 = smov [#allocation5]   ;;  %s415_s27 = int_to_ptr.vmem [resolvable:$true] %s124_s27 }
  0x27   : > { %s269_s4 = scalar_lea.vmem %s415_s27, 128  ;;  %s273_s11 = sshll.u32 %s336_s5, 4  ;;  %s274_s11 = int_to_ptr.vmem [resolvable:$false] %s273_s11 }
  0x28   : > { %p270_p6 = scmp.ne.s32.totalorder %s415_s27, %s269_s4  ;;  %s275_s10 = scalar_lea.vmem %s274_s11, 256 }
  0x29   : > { %p276_p10 = scmp.lt.s32.totalorder %s415_s27, %s274_s11  ;;  %p277_p11 = scmp.lt.s32.totalorder %s275_s10, %s269_s4 }
  0x2a   : > { %p271_p8 = pnand %p270_p6, %p385_p5 }
  0x2b   : > { %p278_p12 = por %p277_p11, %p276_p10 }
  0x2c   : > { %p272_p9 = pneg %p271_p8 }
  0x2e   : > { %p279_p13 = pnand %p278_p12, %p272_p9 }
  0x30   : > { %282 = shalt.err (!%p279_p13)
}
  0x31   : > { %s283_s13 = scalar_lea.hbm %s122_s2, 128  ;;  %s287_s19 = scalar_lea.hbm %s454_s1, 256 }
  0x32   : > { %p284_p0 = scmp.ne.s32.totalorder %s122_s2, %s283_s13  ;;  %p288_p3 = scmp.lt.s32.totalorder %s122_s2, %s454_s1 }
  0x33   : > { %p289_p4 = scmp.lt.s32.totalorder %s287_s19, %s283_s13 }
  0x34   : > { %p285_p1 = pnand %p284_p0, %p385_p5 }
  0x35   : > { %p290_p7 = por %p289_p4, %p288_p3 }
  0x36   : > { %p286_p2 = pneg %p285_p1 }
  0x38   : > { %p291_p6 = pnand %p290_p7, %p286_p2 }
  0x3a   : > { %294 = shalt.err (!%p291_p6)
}
  0x3b   : > { %197 = dma.vmem_to_hbm [thread:$0]  (%p385_p5), %s415_s27, 128, %s122_s2, %s111_s3  }
  0x3c PF: > { %p209_p8 = scmp.ge.s32.totalorder %s333_s9, 2  ;;  %s136_s22 = sand.u32 1, %s321_s6  }
  0x3d   : > { %p458_p9 = scmp.ne.s32.totalorder %s456_s17, 0  ;;  %s137_s23 = scalar_lea.sflag [#allocation4], %s136_s22 }
  0x3f   : > { %p204_p10 = pnand %p209_p8, %p458_p9 }
  0x41   : > { %p205_p11 = pneg %p204_p10 }
  0x43   : > { %316 = dma.done.wait (%p205_p11), %s137_s23, 128  }
  0x44   : > { %318 = vsyncadd (%p205_p11), %s137_s23, 4294967168  ;;  %p12_p12 = scmp.ge.s32.totalorder %s372_s12, 4   ;;  %s459_s6 = smov %s325_s7 }
  0x45   : > { %s460_s7 = smov %s329_s8  ;;  %s461_s8 = smov %s383_s15 }
  0x46   : > { %s462_s9 = smov %s372_s12  ;;  %14 = sbr.rel (!%p12_p12) target bundleno = 4 (0x4), region = 61 }
  0x4b   :  { %142 = vsyncpa [#allocation3], 1 }
  0x4c   :  { %144 = vsyncpa [#allocation3 + $0x1], 1 }
  0x4d   :  { %145 = vsyncpa [#allocation4], 1 }
  0x4e   :  { %147 = vsyncpa [#allocation4 + $0x1], 1 }

// kernel: tpu_custom_call.1
= control target key start
LH: loop header
LB: loop body
LE: loop exit
PB: predicated region body
PF: predicated region fallthrough
CT: control target
= control target key end

     0   :  { %10 = vsyncpa [#allocation3], 0  ;;  %s443_s0 = inlined_call_operand.hbm [shape: f32[8,16], index: 0, kind: input, shape index: {}]   ;;  %s444_s1 = inlined_call_operand.hbm [shape: f32[16,64], index: 1, kind: input, shape index: {}]   ;;  %s445_s2 = inlined_call_operand.vmem [shape: f32[1,64], index: 2, kind: input, shape index: {}]   ;;  %s446_s3 = inlined_call_operand.hbm [shape: f32[64,128], index: 3, kind: input, shape index: {}]   ;;  %s447_s4 = inlined_call_operand.vmem [shape: f32[1,128], index: 4, kind: input, shape index: {}]   ;;  %s448_s5 = inlined_call_operand.hbm [shape: f32[8,128], index: 5, kind: output, shape index: {}]  }
   0x1   :  { %11 = vsyncpa [#allocation6], 0 }
   0x2   :  { %12 = vsyncpa [#allocation4], 0  ;;  %s387_s18 = smov [#allocation5]  }
   0x3   :  { %s28_s19 = sshll.u32 %s387_s18, 4  ;;  %s29_s19 = int_to_ptr.vmem [resolvable:$true] %s28_s19 }
   0x4   :  { %s309_s20 = scalar_lea.vmem %s29_s19, 256  ;;  %p314_p1 = scmp.lt.s32.totalorder %s29_s19, %s29_s19 }
   0x5   :  { %p310_p0 = scmp.ne.s32.totalorder %s29_s19, %s309_s20  ;;  %p315_p2 = scmp.lt.s32.totalorder %s309_s20, %s309_s20 }
   0x7   :  { %p316_p3 = por %p315_p2, %p314_p1 }
   0x9   :  { %p317_p4 = pnand %p316_p3, %p310_p0 }
   0xb   :  { %320 = shalt.err (!%p317_p4)
}
   0xc   :  { %s388_s21 = smov 128   ;;  %s389_s22 = smov 8  }
   0xd   :  { %34 = dma.hbm_to_vmem [thread:$0]  %s444_s1, 256, %s29_s19, [#allocation6], %s388_s21, %s388_s21, %s389_s22  }
   0xe   :  { %s390_s25 = smov [#allocation2]   ;;  %s391_s27 = smov [#allocation7]  }
   0xf   :  { %s19_s26 = sshll.u32 %s390_s25, 4  ;;  %s42_s28 = sshll.u32 %s391_s27, 4  ;;  %s20_s26 = int_to_ptr.vmem [resolvable:$true] %s19_s26  ;;  %s43_s28 = int_to_ptr.vmem [resolvable:$true] %s42_s28 }
  0x10   :  { %s329_s29 = scalar_lea.vmem %s20_s26, 128  ;;  %p334_p6 = scmp.lt.s32.totalorder %s20_s26, %s20_s26 }
  0x11   :  { %p330_p5 = scmp.ne.s32.totalorder %s20_s26, %s329_s29  ;;  %p335_p7 = scmp.lt.s32.totalorder %s329_s29, %s329_s29 }
  0x13   :  { %p336_p8 = por %p335_p7, %p334_p6 }
  0x15   :  { %p337_p9 = pnand %p336_p8, %p330_p5 }
  0x17   :  { %340 = shalt.err (!%p337_p9)
}
  0x18   :  { %22 = dma.hbm_to_vmem [thread:$0]  %s443_s0, 128, %s20_s26, [#allocation3]  }
  0x19   :  { %s349_s7 = scalar_lea.vmem %s43_s28, 1024  ;;  %p354_p11 = scmp.lt.s32.totalorder %s43_s28, %s43_s28 }
  0x1a   :  { %p350_p10 = scmp.ne.s32.totalorder %s43_s28, %s349_s7  ;;  %p355_p12 = scmp.lt.s32.totalorder %s349_s7, %s349_s7 }
  0x1c   :  { %p356_p13 = por %p355_p12, %p354_p11 }
  0x1e   :  { %p357_p0 = pnand %p356_p13, %p350_p10 }
  0x20   :  { %360 = shalt.err (!%p357_p0)
}
  0x21   :  { %48 = dma.hbm_to_vmem [thread:$0]  %s446_s3, 1024, %s43_s28, [#allocation6], %s388_s21, %s388_s21, %s389_s22  }
  0x22   :  { %381 = dma.done.wait [#allocation3], 128  }
  0x23   :  { %382 = vsyncadd [#allocation3], 4294967168 }
  0x24   :  { %383 = dma.done.wait [#allocation6], 1280  }
  0x25   :  { %384 = vsyncadd [#allocation6], 4294966016  ;;  %v392_v0 = vmov 0.0   ;;  %vm393_vm0 = vmmov 0   ;;  %v62_v1 = vld [vmem:[#allocation5 + $0x8] sm:$0xff]  ;;  %v61_v2 = vld [vmem:[#allocation5] sm:$0xff] }
  0x26   :  { %267 = vmatprep.subr.mxu0 %v392_v0  ;;  %271 = vmatprep.mubr.msk.f32.mxu0 %vm393_vm0, %v392_v0  ;;  %v60_v3 = vld [vmem:[#allocation2] sm:$0xff]  ;;  %vm70_vm1 = vcmask 130048   ;;  %v152_v4 = vld [vmem:[#allocation7 + $0x38] sm:$0xff]  ;;  %v151_v5 = vld [vmem:[#allocation7 + $0x30] sm:$0xff]  ;;  %vm160_vm2 = vcmask 523264   ;;  %s394_s11 = smov [#allocation8]  }
  0x27   :  { %274 = vmatprep.subr.mxu1 %v392_v0  ;;  %290 = vmatprep.mubr.msk.f32.mxu1 %vm393_vm0, %v392_v0  ;;  %v150_v6 = vld [vmem:[#allocation7 + $0x28] sm:$0xff]  ;;  %v149_v7 = vld [vmem:[#allocation7 + $0x20] sm:$0xff]  ;;  %v148_v8 = vld [vmem:[#allocation7 + $0x18] sm:$0xff]  ;;  %s241_s12 = sshll.u32 %s394_s11, 4  ;;  %s242_s12 = int_to_ptr.vmem [resolvable:$true] %s241_s12 }
  0x28   :  { %268 = vmatpush3.msra.mxu0 %v62_v1  ;;  %275 = vmatpush3.msra.mxu1 %v152_v4  ;;  %v147_v9 = vld [vmem:[#allocation7 + $0x10] sm:$0xff]  ;;  %v146_v10 = vld [vmem:[#allocation7 + $0x8] sm:$0xff]  ;;  %v145_v11 = vld [vmem:[#allocation7] sm:$0xff]  ;;  %s361_s13 = scalar_lea.vmem %s242_s12, 128  ;;  %p366_p2 = scmp.lt.s32.totalorder %s242_s12, %s242_s12 }
  0x29   :  { %269 = vmatprep.subr.mxu0 %v392_v0  ;;  %276 = vmatprep.subr.mxu1 %v392_v0  ;;  %v251_v12 = vld [vmem:[%s445_s2] ss:$0 sm:$0xff]  ;;  %p362_p1 = scmp.ne.s32.totalorder %s242_s12, %s361_s13  ;;  %p367_p3 = scmp.lt.s32.totalorder %s361_s13, %s361_s13 }
  0x2a   :  { %270 = vmatpush3.msra.mxu0 %v61_v2  ;;  %277 = vmatpush3.msra.mxu1 %v151_v5  ;;  %v253_v17 = vld [vmem:[%s447_s4] ss:$0 sm:$0xff] }
  0x2b   :  { %272 = vmatmul.mubr.msk.f32.vlgmr.msra.gmra.mxu0 %vm70_vm1, %v60_v3  ;;  %278 = vmatprep.subr.mxu1 %v392_v0  ;;  %p368_p4 = por %p367_p3, %p366_p2 }
  0x2c   :  { %279 = vmatpush3.msra.mxu1 %v150_v6 }
  0x2d   :  { %280 = vmatprep.subr.mxu1 %v392_v0  ;;  %p369_p5 = pnand %p368_p4, %p362_p1 }
  0x2e   :  { %281 = vmatpush3.msra.mxu1 %v149_v7 }
  0x2f   :  { %282 = vmatprep.subr.mxu1 %v392_v0 }
  0x30   :  { %283 = vmatpush3.msra.mxu1 %v148_v8 }
  0x31   :  { %284 = vmatprep.subr.mxu1 %v392_v0 }
  0x32   :  { %285 = vmatpush3.msra.mxu1 %v147_v9 }
  0x33   :  { %286 = vmatprep.subr.mxu1 %v392_v0 }
  0x34   :  { %287 = vmatpush3.msra.mxu1 %v146_v10 }
  0x35   :  { %288 = vmatprep.subr.mxu1 %v392_v0 }
  0x36   :  { %289 = vmatpush3.msra.mxu1 %v145_v11 }
  0xeb   :  { %v140_v13 = vpop.f32.mrf.mxu0 }
  0xec   :  { %v141_v14 = vadd.f32 %v251_v12, %v140_v13 }
  0xed   :  { %v273_v15 = vpop.f32.mrf.mxu0 }
  0xee   :  { %v144_v16 = vmax.f32 %v141_v14, 0.0 }
  0xf0   :  { %291 = vmatmul.mubr.msk.f32.vlgmr.msra.gmra.mxu1 %vm160_vm2, %v144_v16 }
 0x1b0   :  { %v230_v18 = vpop.f32.mrf.mxu1 }
 0x1b1   :  { %v231_v19 = vadd.f32 %v253_v17, %v230_v18 }
 0x1b2   :  { %v292_v20 = vpop.f32.mrf.mxu1 }
 0x1b3   :  { %234 = vst [vmem:[#allocation8] sm:$0xff] %v231_v19 }
 0x1b4   :  { %372 = shalt.err (!%p369_p5)
}
 0x1b5   :  { %244 = dma.vmem_to_hbm [thread:$0]  %s242_s12, 128, %s448_s5, [#allocation4]  }
 0x1b6   :  { %385 = dma.done.wait [#allocation4], 128  }
 0x1b7   :  { %386 = vsyncadd [#allocation4], 4294967168 }
 0x1b8   :  { %248 = vsyncpa [#allocation3], 1 }
 0x1b9   :  { %249 = vsyncpa [#allocation6], 1 }
 0x1ba   :  { %250 = vsyncpa [#allocation4], 1 }

</bundles_post_ra>
